<compile_context>
chip_gen: v7x
topology: tpu7x:2x2x1
jax: 0.10.0
libtpu: 0.0.40
codegen_flags: <defaults>
</compile_context>

<pallas_src>
import math

import jax
import jax.numpy as jnp
from jax import lax
from jax.experimental import pallas as pl
from jax.experimental.pallas import tpu as pltpu


_LANE = 128
_SUBLANE = 8


def _round_up(x, m):
    return ((x + m - 1) // m) * m


def _device_kind():
    try:
        return jax.devices()[0].device_kind.lower()
    except Exception:
        return ""


def _spectral_mul_kernel(x_ref, w_ref, o_ref):
    """Per-mode complex channel mixing; retained modes live on the lane axis.

    x_ref: (2, Cin, B,    TM) float32            [0] = real, [1] = imag
    w_ref: (2, Cin, Cout, TM) float32 / bfloat16
    o_ref: (2, B,   Cout, TM) float32
    out[b, o, m] = sum_i x[b, i, m] * w[i, o, m]          (complex)
    """
    cin = x_ref.shape[1]
    batch = x_ref.shape[2]
    cout = w_ref.shape[2]
    tm = x_ref.shape[3]

    acc_r = jnp.zeros((batch, cout, tm), jnp.float32)
    acc_i = jnp.zeros((batch, cout, tm), jnp.float32)

    # Statically unrolled Cin reduction: only the two (B, Cout, TM) accumulators
    # stay live -- no (B, Cin, Cout, TM) broadcast intermediate.
    for i in range(cin):
        xr = x_ref[0, i][:, None, :]                      # (B, 1, TM) f32
        xi = x_ref[1, i][:, None, :]
        wr = w_ref[0, i][None, :, :].astype(jnp.float32)  # (1, Cout, TM)
        wi = w_ref[1, i][None, :, :].astype(jnp.float32)
        # 4-mult / 2-add complex form; each operand loaded once per iteration.
        acc_r = acc_r + (xr * wr - xi * wi)
        acc_i = acc_i + (xr * wi + xi * wr)

    o_ref[0] = acc_r
    o_ref[1] = acc_i


def spectral_modes_matmul(x_ri, w_ri, *, block_modes, vmem_limit_bytes):
    """Mode-wise complex channel contraction via Pallas.

    x_ri: (2, Cin, B,    Mp) float32,          Mp a multiple of block_modes
    w_ri: (2, Cin, Cout, Mp) float32/bfloat16  (Cout padded to multiple of 8)
    returns (2, B, Cout, Mp) float32
    """
    _, cin, batch, mp = x_ri.shape
    cout = w_ri.shape[2]
    tm = int(block_modes)
    assert mp % tm == 0 and tm % _LANE == 0, (mp, tm)

    return pl.pallas_call(
        _spectral_mul_kernel,
        out_shape=jax.ShapeDtypeStruct((2, batch, cout, mp), jnp.float32),
        grid=(mp // tm,),
        in_specs=[
            pl.BlockSpec((2, cin, batch, tm), lambda m: (0, 0, 0, m)),
            pl.BlockSpec((2, cin, cout, tm), lambda m: (0, 0, 0, m)),
        ],
        out_specs=pl.BlockSpec((2, batch, cout, tm), lambda m: (0, 0, 0, m)),
        compiler_params=pltpu.CompilerParams(
            dimension_semantics=("parallel",),
            vmem_limit_bytes=int(vmem_limit_bytes),
        ),
    )(x_ri, w_ri)


class SpectralConv2dUno:
    """JAX/Pallas port of SpectralConv2d_Uno."""

    def __init__(self, in_codim, out_codim, dim1, dim2, modes1=None, modes2=None,
                 *, key, block_modes=2048, weight_dtype=None, force_pallas=False):
        in_codim = int(in_codim)
        out_codim = int(out_codim)
        self.in_channels = in_codim
        self.out_channels = out_codim
        self.dim1 = int(dim1)
        self.dim2 = int(dim2)
        if modes1 is not None:
            self.modes1 = int(modes1)
            self.modes2 = int(modes2)
        else:
            self.modes1 = self.dim1 // 2 - 1
            self.modes2 = self.dim2 // 2
        self.scale = (1.0 / (2.0 * in_codim)) ** 0.5
        self._force_pallas = bool(force_pallas)

        # --- TPU-generation-dependent knobs (per-generation sizing) ----------
        kind = _device_kind()
        is_v7 = "v7" in kind
        has_bf16_vpu = ("v6" in kind) or is_v7
        self._vmem_phys_bytes = (64 << 20) if is_v7 else (128 << 20)
        self._vmem_budget_bytes = (40 << 20) if is_v7 else (80 << 20)
        if weight_dtype is None:
            # bf16 weight stream halves HBM bytes on v6e/v7x (native bf16 VPU);
            # keep f32 on v5e and older (no bf16 VALU -> convert costs slots).
            weight_dtype = jnp.bfloat16 if has_bf16_vpu else jnp.float32
        self._weight_dtype = jnp.dtype(weight_dtype)

        # --- synthetic complex weights ~ scale * complex_randn ---------------
        k1r, k1i, k2r, k2i = jax.random.split(key, 4)
        wshape = (in_codim, out_codim, self.modes1, self.modes2)
        inv_sqrt2 = 1.0 / math.sqrt(2.0)
        self.weights1 = self.scale * lax.complex(
            jax.random.normal(k1r, wshape, jnp.float32) * inv_sqrt2,
            jax.random.normal(k1i, wshape, jnp.float32) * inv_sqrt2)
        self.weights2 = self.scale * lax.complex(
            jax.random.normal(k2r, wshape, jnp.float32) * inv_sqrt2,
            jax.random.normal(k2i, wshape, jnp.float32) * inv_sqrt2)

        # --- hoisted, kernel-ready weight layout (built once) ----------------
        # Concatenate the two corner blocks along kx, flatten (kx, ky) onto the
        # lane axis, split real/imag onto a leading axis, pad Cout to whole
        # sublanes and modes to whole lanes, cast to the streaming dtype.
        m = 2 * self.modes1 * self.modes2
        cout_p = _round_up(max(out_codim, 1), _SUBLANE)
        mp = _round_up(max(m, 1), _LANE)
        w_cat = jnp.concatenate([self.weights1, self.weights2], axis=2)   # (Ci,Co,2m1,m2)
        w_flat = w_cat.reshape(in_codim, out_codim, m)                    # (Ci,Co,M)
        w_ri = jnp.stack([jnp.real(w_flat), jnp.imag(w_flat)])            # (2,Ci,Co,M)
        w_ri = jnp.pad(w_ri, ((0, 0), (0, 0), (0, cout_p - out_codim), (0, mp - m)))
        self._w_ri = w_ri.astype(self._weight_dtype)

        self._num_modes = m
        self._padded_modes = mp
        self._cout_padded = cout_p
        self._block_modes_cap = max(_LANE, (int(block_modes) // _LANE) * _LANE)

    # ------------------------------------------------------------------ tiles
    def _plan_tiles(self, batch):
        """Pick the mode-tile TM and vmem limit from a VMEM footprint budget."""
        cin = self.in_channels
        co_p = self._cout_padded
        mp = self._padded_modes
        w_isz = self._weight_dtype.itemsize

        # bytes per mode column, per pipeline buffer
        per_mode_stream = (2 * cin * batch * 4        # x tile (re+im, f32)
                           + 2 * cin * co_p * w_isz   # w tile (re+im)
                           + 2 * batch * co_p * 4)    # out tile (re+im, f32)
        # double-buffered streams + in-kernel f32 accumulators / transients
        per_mode_total = 2 * per_mode_stream + 6 * batch * co_p * 4

        tm = self._vmem_budget_bytes // max(per_mode_total, 1)
        tm = min(tm, self._block_modes_cap, mp)
        # Keep >= 2 (>= 4 for big Mp) grid steps so "parallel" can shard the
        # mode axis across both v7x TensorCores (no-op cost on v5e/v6e).
        if mp > _LANE:
            target_blocks = 4 if mp >= 8 * _LANE else 2
            tm = min(tm, mp // target_blocks)
        tm = max(_LANE, (tm // _LANE) * _LANE)
        while mp % tm:
            tm -= _LANE

        footprint = per_mode_total * tm
        vmem_limit = max(footprint + (8 << 20), 32 << 20)
        vmem_limit = min(vmem_limit, self._vmem_phys_bytes - (4 << 20))
        return tm, int(vmem_limit)

    # ---------------------------------------------------------------- forward
    def __call__(self, x, dim1=None, dim2=None):
        # Output size resolved locally (no mutation of self.dim1/self.dim2).
        out_dim1 = int(dim1) if dim1 is not None else self.dim1
        out_dim2 = int(dim2) if dim2 is not None else self.dim2
        m1, m2 = self.modes1, self.modes2
        batch, cin = int(x.shape[0]), int(x.shape[1])
        if cin != self.in_channels:
            raise ValueError(f"expected {self.in_channels} input channels, got {cin}")
        cout = self.out_channels
        n_freq2 = out_dim2 // 2 + 1

        # Review correctness note: avoid silently-overlapping / clipped regions.
        if 2 * m1 > out_dim1 or m2 > n_freq2:
            raise ValueError(
                f"modes ({m1}, {m2}) incompatible with output size "
                f"({out_dim1}, {out_dim2}): need 2*modes1 <= dim1 and modes2 <= dim2//2+1")

        # TODO(synk): rfft2/irfft2 have no Pallas primitive; FFTs stay in plain JAX.
        x_ft = jnp.fft.rfft2(x, norm="forward")                  # (B, Cin, H, W//2+1)
        h_in, w_in = int(x_ft.shape[2]), int(x_ft.shape[3])
        if m1 > h_in or m2 > w_in:
            raise ValueError(
                f"modes ({m1}, {m2}) incompatible with input grid "
                f"({x.shape[2]}, {x.shape[3]})")

        m_total, mp = self._num_modes, self._padded_modes
        use_pallas = m_total > 0 and (
            self._force_pallas or m_total > _LANE or batch * cin * cout > 4096)

        if not use_pallas:
            # Tiny single-block configs: XLA's fused einsum beats kernel launch
            # + DMA setup with no pipelining.
            out_top = jnp.einsum("bixy,ioxy->boxy",
                                 x_ft[:, :, :m1, :m2], self.weights1)
            out_bot = jnp.einsum("bixy,ioxy->boxy",
                                 x_ft[:, :, h_in - m1:, :m2], self.weights2)
        else:
            # Gather the retained corner modes (same rows the PyTorch code reads),
            # flatten (kx, ky) onto the lane axis, put B on x's sublane axis.
            x_cat = jnp.concatenate(
                [x_ft[:, :, :m1, :m2], x_ft[:, :, h_in - m1:, :m2]], axis=2)
            x_flat = x_cat.reshape(batch, cin, m_total).transpose(1, 0, 2)   # (Cin,B,M)
            x_ri = jnp.stack([jnp.real(x_flat), jnp.imag(x_flat)])           # (2,Cin,B,M)
            x_ri = jnp.pad(x_ri.astype(jnp.float32),
                           ((0, 0), (0, 0), (0, 0), (0, mp - m_total)))

            tm, vmem_limit = self._plan_tiles(batch)
            out_ri = spectral_modes_matmul(
                x_ri, self._w_ri, block_modes=tm, vmem_limit_bytes=vmem_limit)

            out_c = lax.complex(out_ri[0, :, :cout, :m_total],
                                out_ri[1, :, :cout, :m_total])               # (B,Co,M)
            out_c = out_c.reshape(batch, cout, 2 * m1, m2)
            out_top, out_bot = out_c[:, :, :m1, :], out_c[:, :, m1:, :]

        out_ft = jnp.zeros((batch, cout, out_dim1, n_freq2), dtype=jnp.complex64)
        out_ft = out_ft.at[:, :, :m1, :m2].set(out_top)
        out_ft = out_ft.at[:, :, out_dim1 - m1:, :m2].set(out_bot)
        return jnp.fft.irfft2(out_ft, s=(out_dim1, out_dim2), norm="forward")


def _reference_forward(x, layer, dim1, dim2):
    """Pure-JAX reference mirroring the PyTorch module."""
    x_ft = jnp.fft.rfft2(x, norm="forward")
    m1, m2 = layer.modes1, layer.modes2
    batch, cout = x.shape[0], layer.out_channels
    out_ft = jnp.zeros((batch, cout, dim1, dim2 // 2 + 1), dtype=jnp.complex64)
    out_ft = out_ft.at[:, :, :m1, :m2].set(
        jnp.einsum("bixy,ioxy->boxy", x_ft[:, :, :m1, :m2], layer.weights1))
    out_ft = out_ft.at[:, :, dim1 - m1:, :m2].set(
        jnp.einsum("bixy,ioxy->boxy", x_ft[:, :, -m1:, :m2], layer.weights2))
    return jnp.fft.irfft2(out_ft, s=(dim1, dim2), norm="forward")


if __name__ == "__main__":
    key = jax.random.PRNGKey(0)
    k_x1, k_w1, k_x2, k_w2 = jax.random.split(key, 4)

    # --- Test A: module-default small config (2, 4, 16, 16) -------------------
    batch, cin, cout = 2, 4, 4
    h = w = 16
    x_small = jax.random.normal(k_x1, (batch, cin, h, w), dtype=jnp.float32)

    #   A1: auto dispatch (single 128-lane block -> plain einsum fallback path)
    layer_a = SpectralConv2dUno(cin, cout, h, w, key=k_w1)
    out_a = jax.block_until_ready(layer_a(x_small))
    assert out_a.shape == (batch, cout, h, w), out_a.shape
    ref_small = _reference_forward(x_small, layer_a, h, w)
    assert jnp.allclose(out_a, ref_small, atol=1e-5, rtol=1e-5), \
        float(jnp.max(jnp.abs(out_a - ref_small)))

    #   A2: force the Pallas kernel at the same shape (exercises lane padding
    #       M=112 -> 128 and sublane padding Cout 4 -> 8)
    layer_b = SpectralConv2dUno(cin, cout, h, w, key=k_w1,
                                weight_dtype=jnp.float32, force_pallas=True)
    out_b = jax.block_until_ready(layer_b(x_small))
    assert jnp.allclose(out_b, ref_small, atol=1e-5, rtol=1e-5), \
        float(jnp.max(jnp.abs(out_b - ref_small)))

    # --- Test B: multi-block mode grid, f32 weights, tight tolerance ----------
    batch2, cin2, cout2 = 2, 8, 8
    h2 = w2 = 64                        # modes1 = 31, modes2 = 32 -> M = 1984
    x_big = jax.random.normal(k_x2, (batch2, cin2, h2, w2), dtype=jnp.float32)
    layer_c = SpectralConv2dUno(cin2, cout2, h2, w2, key=k_w2,
                                weight_dtype=jnp.float32)
    out_c = jax.block_until_ready(layer_c(x_big))
    assert out_c.shape == (batch2, cout2, h2, w2), out_c.shape
    ref_big = _reference_forward(x_big, layer_c, h2, w2)
    assert jnp.allclose(out_c, ref_big, atol=1e-4, rtol=1e-4), \
        float(jnp.max(jnp.abs(out_c - ref_big)))

    # --- Test C: auto weight dtype (bf16 stream on v6e/v7x) -------------------
    layer_d = SpectralConv2dUno(cin2, cout2, h2, w2, key=k_w2)
    out_d = jax.block_until_ready(layer_d(x_big))
    assert bool(jnp.all(jnp.isfinite(out_d)))
    scale = 1.0 + float(jnp.max(jnp.abs(ref_big)))
    assert float(jnp.max(jnp.abs(out_d - ref_big))) < 0.05 * scale

    print("KERNEL_OK")
</pallas_src>

<mosaic_0001>
module attributes {stable_mosaic.version = 11 : i64} {
  func.func @_spectral_mul_kernel(%arg0: i32, %arg1: memref<2x4x2x128xf32, #tpu.memory_space<vmem>>, %arg2: memref<2x4x8x128xf32, #tpu.memory_space<vmem>>, %arg3: memref<2x2x8x128xf32, #tpu.memory_space<vmem>>) attributes {dimension_semantics = [#tpu.dimension_semantics<parallel>], iteration_bounds = array<i64: 1>, scalar_prefetch = 0 : i64, scratch_operands = 0 : i64, tpu.core_type = #tpu.core_type<tc>, window_params = [{transform_indices = @transform_0, window_bounds = array<i64: 2, 4, 2, 128>}, {transform_indices = @transform_1, window_bounds = array<i64: 2, 4, 8, 128>}, {transform_indices = @transform_2, window_bounds = array<i64: 2, 2, 8, 128>}]} {
    %cst = arith.constant 0.000000e+00 : f32
    %0 = vector.broadcast %cst : f32 to vector<2x8x128xf32>
    %cst_0 = arith.constant 0.000000e+00 : f32
    %1 = vector.broadcast %cst_0 : f32 to vector<2x8x128xf32>
    %c0 = arith.constant 0 : index
    %c0_1 = arith.constant 0 : index
    %c0_2 = arith.constant 0 : index
    %c0_3 = arith.constant 0 : index
    %2 = vector.load %arg1[%c0, %c0_1, %c0_2, %c0_3] : memref<2x4x2x128xf32, #tpu.memory_space<vmem>>, vector<1x1x2x128xf32>
    %3 = vector.shape_cast %2 : vector<1x1x2x128xf32> to vector<2x128xf32>
    %4 = vector.shape_cast %3 : vector<2x128xf32> to vector<2x1x128xf32>
    %c1 = arith.constant 1 : index
    %c0_4 = arith.constant 0 : index
    %c0_5 = arith.constant 0 : index
    %c0_6 = arith.constant 0 : index
    %5 = vector.load %arg1[%c1, %c0_4, %c0_5, %c0_6] : memref<2x4x2x128xf32, #tpu.memory_space<vmem>>, vector<1x1x2x128xf32>
    %6 = vector.shape_cast %5 : vector<1x1x2x128xf32> to vector<2x128xf32>
    %7 = vector.shape_cast %6 : vector<2x128xf32> to vector<2x1x128xf32>
    %c0_7 = arith.constant 0 : index
    %c0_8 = arith.constant 0 : index
    %c0_9 = arith.constant 0 : index
    %c0_10 = arith.constant 0 : index
    %8 = vector.load %arg2[%c0_7, %c0_8, %c0_9, %c0_10] : memref<2x4x8x128xf32, #tpu.memory_space<vmem>>, vector<1x1x8x128xf32>
    %9 = vector.shape_cast %8 : vector<1x1x8x128xf32> to vector<8x128xf32>
    %10 = vector.shape_cast %9 : vector<8x128xf32> to vector<1x8x128xf32>
    %c1_11 = arith.constant 1 : index
    %c0_12 = arith.constant 0 : index
    %c0_13 = arith.constant 0 : index
    %c0_14 = arith.constant 0 : index
    %11 = vector.load %arg2[%c1_11, %c0_12, %c0_13, %c0_14] : memref<2x4x8x128xf32, #tpu.memory_space<vmem>>, vector<1x1x8x128xf32>
    %12 = vector.shape_cast %11 : vector<1x1x8x128xf32> to vector<8x128xf32>
    %13 = vector.shape_cast %12 : vector<8x128xf32> to vector<1x8x128xf32>
    %14 = vector.broadcast %4 : vector<2x1x128xf32> to vector<2x8x128xf32>
    %15 = vector.broadcast %10 : vector<1x8x128xf32> to vector<2x8x128xf32>
    %16 = arith.mulf %14, %15 : vector<2x8x128xf32>
    %17 = vector.broadcast %7 : vector<2x1x128xf32> to vector<2x8x128xf32>
    %18 = vector.broadcast %13 : vector<1x8x128xf32> to vector<2x8x128xf32>
    %19 = arith.mulf %17, %18 : vector<2x8x128xf32>
    %20 = arith.subf %16, %19 : vector<2x8x128xf32>
    %21 = arith.addf %0, %20 : vector<2x8x128xf32>
    %22 = vector.broadcast %4 : vector<2x1x128xf32> to vector<2x8x128xf32>
    %23 = vector.broadcast %13 : vector<1x8x128xf32> to vector<2x8x128xf32>
    %24 = arith.mulf %22, %23 : vector<2x8x128xf32>
    %25 = vector.broadcast %7 : vector<2x1x128xf32> to vector<2x8x128xf32>
    %26 = vector.broadcast %10 : vector<1x8x128xf32> to vector<2x8x128xf32>
    %27 = arith.mulf %25, %26 : vector<2x8x128xf32>
    %28 = arith.addf %24, %27 : vector<2x8x128xf32>
    %29 = arith.addf %1, %28 : vector<2x8x128xf32>
    %c0_15 = arith.constant 0 : index
    %c1_16 = arith.constant 1 : index
    %c0_17 = arith.constant 0 : index
    %c0_18 = arith.constant 0 : index
    %30 = vector.load %arg1[%c0_15, %c1_16, %c0_17, %c0_18] : memref<2x4x2x128xf32, #tpu.memory_space<vmem>>, vector<1x1x2x128xf32>
    %31 = vector.shape_cast %30 : vector<1x1x2x128xf32> to vector<2x128xf32>
    %32 = vector.shape_cast %31 : vector<2x128xf32> to vector<2x1x128xf32>
    %c1_19 = arith.constant 1 : index
    %c1_20 = arith.constant 1 : index
    %c0_21 = arith.constant 0 : index
    %c0_22 = arith.constant 0 : index
    %33 = vector.load %arg1[%c1_19, %c1_20, %c0_21, %c0_22] : memref<2x4x2x128xf32, #tpu.memory_space<vmem>>, vector<1x1x2x128xf32>
    %34 = vector.shape_cast %33 : vector<1x1x2x128xf32> to vector<2x128xf32>
    %35 = vector.shape_cast %34 : vector<2x128xf32> to vector<2x1x128xf32>
    %c0_23 = arith.constant 0 : index
    %c1_24 = arith.constant 1 : index
    %c0_25 = arith.constant 0 : index
    %c0_26 = arith.constant 0 : index
    %36 = vector.load %arg2[%c0_23, %c1_24, %c0_25, %c0_26] : memref<2x4x8x128xf32, #tpu.memory_space<vmem>>, vector<1x1x8x128xf32>
    %37 = vector.shape_cast %36 : vector<1x1x8x128xf32> to vector<8x128xf32>
    %38 = vector.shape_cast %37 : vector<8x128xf32> to vector<1x8x128xf32>
    %c1_27 = arith.constant 1 : index
    %c1_28 = arith.constant 1 : index
    %c0_29 = arith.constant 0 : index
    %c0_30 = arith.constant 0 : index
    %39 = vector.load %arg2[%c1_27, %c1_28, %c0_29, %c0_30] : memref<2x4x8x128xf32, #tpu.memory_space<vmem>>, vector<1x1x8x128xf32>
    %40 = vector.shape_cast %39 : vector<1x1x8x128xf32> to vector<8x128xf32>
    %41 = vector.shape_cast %40 : vector<8x128xf32> to vector<1x8x128xf32>
    %42 = vector.broadcast %32 : vector<2x1x128xf32> to vector<2x8x128xf32>
    %43 = vector.broadcast %38 : vector<1x8x128xf32> to vector<2x8x128xf32>
    %44 = arith.mulf %42, %43 : vector<2x8x128xf32>
    %45 = vector.broadcast %35 : vector<2x1x128xf32> to vector<2x8x128xf32>
    %46 = vector.broadcast %41 : vector<1x8x128xf32> to vector<2x8x128xf32>
    %47 = arith.mulf %45, %46 : vector<2x8x128xf32>
    %48 = arith.subf %44, %47 : vector<2x8x128xf32>
    %49 = arith.addf %21, %48 : vector<2x8x128xf32>
    %50 = vector.broadcast %32 : vector<2x1x128xf32> to vector<2x8x128xf32>
    %51 = vector.broadcast %41 : vector<1x8x128xf32> to vector<2x8x128xf32>
    %52 = arith.mulf %50, %51 : vector<2x8x128xf32>
    %53 = vector.broadcast %35 : vector<2x1x128xf32> to vector<2x8x128xf32>
    %54 = vector.broadcast %38 : vector<1x8x128xf32> to vector<2x8x128xf32>
    %55 = arith.mulf %53, %54 : vector<2x8x128xf32>
    %56 = arith.addf %52, %55 : vector<2x8x128xf32>
    %57 = arith.addf %29, %56 : vector<2x8x128xf32>
    %c0_31 = arith.constant 0 : index
    %c2 = arith.constant 2 : index
    %c0_32 = arith.constant 0 : index
    %c0_33 = arith.constant 0 : index
    %58 = vector.load %arg1[%c0_31, %c2, %c0_32, %c0_33] : memref<2x4x2x128xf32, #tpu.memory_space<vmem>>, vector<1x1x2x128xf32>
    %59 = vector.shape_cast %58 : vector<1x1x2x128xf32> to vector<2x128xf32>
    %60 = vector.shape_cast %59 : vector<2x128xf32> to vector<2x1x128xf32>
    %c1_34 = arith.constant 1 : index
    %c2_35 = arith.constant 2 : index
    %c0_36 = arith.constant 0 : index
    %c0_37 = arith.constant 0 : index
    %61 = vector.load %arg1[%c1_34, %c2_35, %c0_36, %c0_37] : memref<2x4x2x128xf32, #tpu.memory_space<vmem>>, vector<1x1x2x128xf32>
    %62 = vector.shape_cast %61 : vector<1x1x2x128xf32> to vector<2x128xf32>
    %63 = vector.shape_cast %62 : vector<2x128xf32> to vector<2x1x128xf32>
    %c0_38 = arith.constant 0 : index
    %c2_39 = arith.constant 2 : index
    %c0_40 = arith.constant 0 : index
    %c0_41 = arith.constant 0 : index
    %64 = vector.load %arg2[%c0_38, %c2_39, %c0_40, %c0_41] : memref<2x4x8x128xf32, #tpu.memory_space<vmem>>, vector<1x1x8x128xf32>
    %65 = vector.shape_cast %64 : vector<1x1x8x128xf32> to vector<8x128xf32>
    %66 = vector.shape_cast %65 : vector<8x128xf32> to vector<1x8x128xf32>
    %c1_42 = arith.constant 1 : index
    %c2_43 = arith.constant 2 : index
    %c0_44 = arith.constant 0 : index
    %c0_45 = arith.constant 0 : index
    %67 = vector.load %arg2[%c1_42, %c2_43, %c0_44, %c0_45] : memref<2x4x8x128xf32, #tpu.memory_space<vmem>>, vector<1x1x8x128xf32>
    %68 = vector.shape_cast %67 : vector<1x1x8x128xf32> to vector<8x128xf32>
    %69 = vector.shape_cast %68 : vector<8x128xf32> to vector<1x8x128xf32>
    %70 = vector.broadcast %60 : vector<2x1x128xf32> to vector<2x8x128xf32>
    %71 = vector.broadcast %66 : vector<1x8x128xf32> to vector<2x8x128xf32>
    %72 = arith.mulf %70, %71 : vector<2x8x128xf32>
    %73 = vector.broadcast %63 : vector<2x1x128xf32> to vector<2x8x128xf32>
    %74 = vector.broadcast %69 : vector<1x8x128xf32> to vector<2x8x128xf32>
    %75 = arith.mulf %73, %74 : vector<2x8x128xf32>
    %76 = arith.subf %72, %75 : vector<2x8x128xf32>
    %77 = arith.addf %49, %76 : vector<2x8x128xf32>
    %78 = vector.broadcast %60 : vector<2x1x128xf32> to vector<2x8x128xf32>
    %79 = vector.broadcast %69 : vector<1x8x128xf32> to vector<2x8x128xf32>
    %80 = arith.mulf %78, %79 : vector<2x8x128xf32>
    %81 = vector.broadcast %63 : vector<2x1x128xf32> to vector<2x8x128xf32>
    %82 = vector.broadcast %66 : vector<1x8x128xf32> to vector<2x8x128xf32>
    %83 = arith.mulf %81, %82 : vector<2x8x128xf32>
    %84 = arith.addf %80, %83 : vector<2x8x128xf32>
    %85 = arith.addf %57, %84 : vector<2x8x128xf32>
    %c0_46 = arith.constant 0 : index
    %c3 = arith.constant 3 : index
    %c0_47 = arith.constant 0 : index
    %c0_48 = arith.constant 0 : index
    %86 = vector.load %arg1[%c0_46, %c3, %c0_47, %c0_48] : memref<2x4x2x128xf32, #tpu.memory_space<vmem>>, vector<1x1x2x128xf32>
    %87 = vector.shape_cast %86 : vector<1x1x2x128xf32> to vector<2x128xf32>
    %88 = vector.shape_cast %87 : vector<2x128xf32> to vector<2x1x128xf32>
    %c1_49 = arith.constant 1 : index
    %c3_50 = arith.constant 3 : index
    %c0_51 = arith.constant 0 : index
    %c0_52 = arith.constant 0 : index
    %89 = vector.load %arg1[%c1_49, %c3_50, %c0_51, %c0_52] : memref<2x4x2x128xf32, #tpu.memory_space<vmem>>, vector<1x1x2x128xf32>
    %90 = vector.shape_cast %89 : vector<1x1x2x128xf32> to vector<2x128xf32>
    %91 = vector.shape_cast %90 : vector<2x128xf32> to vector<2x1x128xf32>
    %c0_53 = arith.constant 0 : index
    %c3_54 = arith.constant 3 : index
    %c0_55 = arith.constant 0 : index
    %c0_56 = arith.constant 0 : index
    %92 = vector.load %arg2[%c0_53, %c3_54, %c0_55, %c0_56] : memref<2x4x8x128xf32, #tpu.memory_space<vmem>>, vector<1x1x8x128xf32>
    %93 = vector.shape_cast %92 : vector<1x1x8x128xf32> to vector<8x128xf32>
    %94 = vector.shape_cast %93 : vector<8x128xf32> to vector<1x8x128xf32>
    %c1_57 = arith.constant 1 : index
    %c3_58 = arith.constant 3 : index
    %c0_59 = arith.constant 0 : index
    %c0_60 = arith.constant 0 : index
    %95 = vector.load %arg2[%c1_57, %c3_58, %c0_59, %c0_60] : memref<2x4x8x128xf32, #tpu.memory_space<vmem>>, vector<1x1x8x128xf32>
    %96 = vector.shape_cast %95 : vector<1x1x8x128xf32> to vector<8x128xf32>
    %97 = vector.shape_cast %96 : vector<8x128xf32> to vector<1x8x128xf32>
    %98 = vector.broadcast %88 : vector<2x1x128xf32> to vector<2x8x128xf32>
    %99 = vector.broadcast %94 : vector<1x8x128xf32> to vector<2x8x128xf32>
    %100 = arith.mulf %98, %99 : vector<2x8x128xf32>
    %101 = vector.broadcast %91 : vector<2x1x128xf32> to vector<2x8x128xf32>
    %102 = vector.broadcast %97 : vector<1x8x128xf32> to vector<2x8x128xf32>
    %103 = arith.mulf %101, %102 : vector<2x8x128xf32>
    %104 = arith.subf %100, %103 : vector<2x8x128xf32>
    %105 = arith.addf %77, %104 : vector<2x8x128xf32>
    %106 = vector.broadcast %88 : vector<2x1x128xf32> to vector<2x8x128xf32>
    %107 = vector.broadcast %97 : vector<1x8x128xf32> to vector<2x8x128xf32>
    %108 = arith.mulf %106, %107 : vector<2x8x128xf32>
    %109 = vector.broadcast %91 : vector<2x1x128xf32> to vector<2x8x128xf32>
    %110 = vector.broadcast %94 : vector<1x8x128xf32> to vector<2x8x128xf32>
    %111 = arith.mulf %109, %110 : vector<2x8x128xf32>
    %112 = arith.addf %108, %111 : vector<2x8x128xf32>
    %113 = arith.addf %85, %112 : vector<2x8x128xf32>
    %c0_61 = arith.constant 0 : index
    %c0_62 = arith.constant 0 : index
    %c0_63 = arith.constant 0 : index
    %c0_64 = arith.constant 0 : index
    %114 = vector.load %arg3[%c0_61, %c0_62, %c0_63, %c0_64] : memref<2x2x8x128xf32, #tpu.memory_space<vmem>>, vector<1x2x8x128xf32>
    %115 = vector.shape_cast %114 : vector<1x2x8x128xf32> to vector<2x8x128xf32>
    %116 = vector.shape_cast %105 : vector<2x8x128xf32> to vector<1x2x8x128xf32>
    tpu.vector_store %arg3[%c0_61, %c0_62, %c0_63, %c0_64], %116 {strides = array<i32>} : memref<2x2x8x128xf32, #tpu.memory_space<vmem>>, vector<1x2x8x128xf32>,
    %c1_65 = arith.constant 1 : index
    %c0_66 = arith.constant 0 : index
    %c0_67 = arith.constant 0 : index
    %c0_68 = arith.constant 0 : index
    %117 = vector.load %arg3[%c1_65, %c0_66, %c0_67, %c0_68] : memref<2x2x8x128xf32, #tpu.memory_space<vmem>>, vector<1x2x8x128xf32>
    %118 = vector.shape_cast %117 : vector<1x2x8x128xf32> to vector<2x8x128xf32>
    %119 = vector.shape_cast %113 : vector<2x8x128xf32> to vector<1x2x8x128xf32>
    tpu.vector_store %arg3[%c1_65, %c0_66, %c0_67, %c0_68], %119 {strides = array<i32>} : memref<2x2x8x128xf32, #tpu.memory_space<vmem>>, vector<1x2x8x128xf32>,
    return
  }
  func.func @transform_0(%arg0: i32) -> (i32, i32, i32, i32) {
    %c0_i32 = arith.constant 0 : i32
    %c0_i32_0 = arith.constant 0 : i32
    %c0_i32_1 = arith.constant 0 : i32
    %c0_i32_2 = arith.constant 0 : i32
    return %c0_i32, %c0_i32_0, %c0_i32_1, %arg0 : i32, i32, i32, i32
  }
  func.func @transform_1(%arg0: i32) -> (i32, i32, i32, i32) {
    %c0_i32 = arith.constant 0 : i32
    %c0_i32_0 = arith.constant 0 : i32
    %c0_i32_1 = arith.constant 0 : i32
    %c0_i32_2 = arith.constant 0 : i32
    return %c0_i32, %c0_i32_0, %c0_i32_1, %arg0 : i32, i32, i32, i32
  }
  func.func @transform_2(%arg0: i32) -> (i32, i32, i32, i32) {
    %c0_i32 = arith.constant 0 : i32
    %c0_i32_0 = arith.constant 0 : i32
    %c0_i32_1 = arith.constant 0 : i32
    %c0_i32_2 = arith.constant 0 : i32
    return %c0_i32, %c0_i32_0, %c0_i32_1, %arg0 : i32, i32, i32, i32
  }
}

</mosaic_0001>

<bundles_post_ra>
// kernel: tpu_custom_call.1
= control target key start
LH: loop header
LB: loop body
LE: loop exit
PB: predicated region body
PF: predicated region fallthrough
CT: control target
= control target key end

     0   :  { %7 = vsyncpa [#allocation3], 0  ;;  %s666_s0 = inlined_call_operand.hbm [shape: f32[2,4,2,128], index: 0, kind: input, shape index: {}]   ;;  %s667_s1 = inlined_call_operand.hbm [shape: f32[2,4,8,128], index: 1, kind: input, shape index: {}]   ;;  %s668_s2 = inlined_call_operand.hbm [shape: f32[2,2,8,128], index: 2, kind: output, shape index: {}]  }
   0x1   :  { %8 = vsyncpa [#allocation6], 0 }
   0x2   :  { %9 = vsyncpa [#allocation4], 0  ;;  %s509_s9 = smov [#allocation2]   ;;  %s437_s13 = scalar_lea.hbm %s666_s0, 256 }
   0x3   :  { %s15_s10 = sshll.u32 %s509_s9, 4  ;;  %p438_p0 = scmp.ne.s32.totalorder %s666_s0, %s437_s13  ;;  %s16_s10 = int_to_ptr.vmem [resolvable:$true] %s15_s10 }
   0x4   :  { %p441_p1 = scmp.lt.u32.totalorder %s437_s13, %s666_s0 }
   0x6   :  { %p443_p2 = pnand %p441_p1, %p438_p0 }
   0x8   :  { %446 = shalt.err (!%p443_p2)
}
   0x9   :  { %s447_s18 = scalar_lea.vmem %s16_s10, 256  ;;  %p452_p4 = scmp.lt.s32.totalorder %s16_s10, %s16_s10 }
   0xa   :  { %p448_p3 = scmp.ne.s32.totalorder %s16_s10, %s447_s18  ;;  %p453_p5 = scmp.lt.s32.totalorder %s447_s18, %s447_s18 }
   0xc   :  { %p454_p6 = por %p453_p5, %p452_p4 }
   0xe   :  { %p455_p7 = pnand %p454_p6, %p448_p3 }
  0x10   :  { %458 = shalt.err (!%p455_p7)
}
  0x11   :  { %s510_s19 = smov 32   ;;  %s511_s20 = smov 2  }
  0x12   :  { %21 = dma.hbm_to_vmem [thread:$0]  %s666_s0, 256, %s16_s10, [#allocation3], %s510_s19, %s510_s19, %s511_s20  }
  0x13   :  { %s512_s23 = smov [#allocation5]   ;;  %s459_s27 = scalar_lea.hbm %s667_s1, 1024 }
  0x14   :  { %s27_s24 = sshll.u32 %s512_s23, 4  ;;  %p460_p8 = scmp.ne.s32.totalorder %s667_s1, %s459_s27  ;;  %s28_s24 = int_to_ptr.vmem [resolvable:$true] %s27_s24 }
  0x15   :  { %p463_p9 = scmp.lt.u32.totalorder %s459_s27, %s667_s1 }
  0x17   :  { %p465_p10 = pnand %p463_p9, %p460_p8 }
  0x19   :  { %468 = shalt.err (!%p465_p10)
}
  0x1a   :  { %s469_s4 = scalar_lea.vmem %s28_s24, 1024  ;;  %p474_p12 = scmp.lt.s32.totalorder %s28_s24, %s28_s24 }
  0x1b   :  { %p470_p11 = scmp.ne.s32.totalorder %s28_s24, %s469_s4  ;;  %p475_p13 = scmp.lt.s32.totalorder %s469_s4, %s469_s4 }
  0x1d   :  { %p476_p0 = por %p475_p13, %p474_p12 }
  0x1f   :  { %p477_p1 = pnand %p476_p0, %p470_p11 }
  0x21   :  { %480 = shalt.err (!%p477_p1)
}
  0x22   :  { %s513_s0 = smov 128   ;;  %s514_s5 = smov 8  }
  0x23   :  { %33 = dma.hbm_to_vmem [thread:$0]  %s667_s1, 1024, %s28_s24, [#allocation6], %s513_s0, %s513_s0, %s514_s5  }
  0x24   :  { %503 = dma.done.wait [#allocation3], 256  }
  0x25   :  { %504 = vsyncadd [#allocation3], 4294967040 }
  0x26   :  { %505 = dma.done.wait [#allocation6], 1024  }
  0x27   :  { %506 = vsyncadd [#allocation6], 4294966272  ;;  %v53_v0 = vlaneseq  ;;  %v515_v1 = vmov 1966171168   ;;  %v565_v12 = vld [vmem:[#allocation5] sm:$0xff]  ;;  %v574_v23 = vld [vmem:[#allocation5 + $0x8] sm:$0xff] }
  0x28   :  { %v51_v2 = vunpack.c.l.s4 %v515_v1  ;;  %v421_v7 = vld.sshfl [vmem:[#allocation2] sm:$0x11 pattern:$0x75316420]  ;;  %v567_v15 = vld [vmem:[#allocation5 + $0x20] sm:$0xff]  ;;  %v578_v28 = vld [vmem:[#allocation5 + $0x28] sm:$0xff] }
  0x29   :  { %v54_v3 = vshrl.u32 %v53_v0, 7  ;;  %v422_v9 = vld.sshfl [vmem:[#allocation2 + $0x8] sm:$0x11 pattern:$0x75316420]  ;;  %v49_v10 = vcombine.high %v421_v7, %v421_v7  ;;  %v588_v36 = vld [vmem:[#allocation5 + $0x10] sm:$0xff] }
  0x2a   :  { %v52_v4 = vunpack.c.0.s8 %v51_v2  ;;  %v423_v13 = vld.sshfl [vmem:[#allocation2 + $0x2] sm:$0x11 pattern:$0x75316420]  ;;  %v74_v14 = vcombine.high %v422_v9, %v422_v9  ;;  %v603_v49 = vld [vmem:[#allocation5 + $0x18] sm:$0xff]  ;;  %s516_s1 = smov [#allocation7]  }
  0x2b   :  { %v561_v6 = vsub.s32 0, %v54_v3  ;;  %v424_v18 = vld.sshfl [vmem:[#allocation2 + $0xa] sm:$0x11 pattern:$0x75316420]  ;;  %v138_v20 = vcombine.high %v423_v13, %v423_v13  ;;  %v594_v40 = vld [vmem:[#allocation5 + $0x30] sm:$0xff] }
  0x2c   :  { %v559_v5 = vsub.s32 %v52_v4, %v54_v3  ;;  %v425_v24 = vld.sshfl [vmem:[#allocation2 + $0x4] sm:$0x11 pattern:$0x75316420]  ;;  %v163_v26 = vcombine.high %v424_v18, %v424_v18  ;;  %v606_v51 = vld [vmem:[#allocation5 + $0x38] sm:$0xff]  ;;  %s408_s8 = sshll.u32 %s516_s1, 4  ;;  %s409_s8 = int_to_ptr.vmem [resolvable:$true] %s408_s8 }
  0x2d   :  { %v426_v31 = vld.sshfl [vmem:[#allocation2 + $0xc] sm:$0x11 pattern:$0x75316420]  ;;  %v228_v62 = vcombine.high %v425_v24, %v425_v24  ;;  %s481_s9 = scalar_lea.vmem %s409_s8, 512  ;;  %p486_p3 = scmp.lt.s32.totalorder %s409_s8, %s409_s8 }
  0x2e   :  { %v56_v8 = vrot.slane %v421_v7, %v559_v5  ;;  %v81_v11 = vrot.slane %v422_v9, %v559_v5  ;;  %v145_v17 = vrot.slane %v423_v13, %v559_v5  ;;  %v63_v19 = vrot.slane %v49_v10, %v559_v5  ;;  %v427_v37 = vld.sshfl [vmem:[#allocation2 + $0x6] sm:$0x11 pattern:$0x75316420]  ;;  %p482_p2 = scmp.ne.s32.totalorder %s409_s8, %s481_s9  ;;  %p487_p4 = scmp.lt.s32.totalorder %s481_s9, %s481_s9 }
  0x2f   :  { %v170_v22 = vrot.slane %v424_v18, %v559_v5  ;;  %v88_v25 = vrot.slane %v74_v14, %v559_v5  ;;  %v235_v30 = vrot.slane %v425_v24, %v559_v5  ;;  %v260_v35 = vrot.slane %v426_v31, %v559_v5  ;;  %v428_v43 = vld.sshfl [vmem:[#allocation2 + $0xe] sm:$0x11 pattern:$0x75316420] }
  0x30   :  { %v95_v16 = vrot.slane %v56_v8, %v561_v6  ;;  %v107_v21 = vrot.slane %v81_v11, %v561_v6  ;;  %v185_v29 = vrot.slane %v145_v17, %v561_v6  ;;  %v583_v32 = vrot.slane %v63_v19, %v561_v6  ;;  %p488_p5 = por %p487_p4, %p486_p3 }
  0x31   :  { %v197_v34 = vrot.slane %v170_v22, %v561_v6  ;;  %v591_v38 = vrot.slane %v88_v25, %v561_v6  ;;  %v275_v41 = vrot.slane %v235_v30, %v561_v6  ;;  %v325_v42 = vrot.slane %v427_v37, %v559_v5 }
  0x32   :  { %v102_v27 = vmul.f32 %v95_v16, %v565_v12  ;;  %v114_v33 = vmul.f32 %v107_v21, %v567_v15  ;;  %v192_v39 = vmul.f32 %v185_v29, %v574_v23  ;;  %v103_v44 = vmul.f32 %v583_v32, %v565_v12  ;;  %p489_p6 = pnand %p488_p5, %p482_p2 }
  0x33   :  { %v204_v46 = vmul.f32 %v197_v34, %v578_v28  ;;  %v287_v47 = vrot.slane %v260_v35, %v561_v6  ;;  %v350_v48 = vrot.slane %v428_v43, %v559_v5  ;;  %v282_v50 = vmul.f32 %v275_v41, %v588_v36 }
  0x34   :  { %v116_v45 = vsub.f32 %v102_v27, %v114_v33  ;;  %v365_v52 = vrot.slane %v325_v42, %v561_v6  ;;  %v115_v53 = vmul.f32 %v591_v38, %v567_v15  ;;  %v152_v54 = vrot.slane %v138_v20, %v559_v5 }
  0x35   :  { %v206_v55 = vsub.f32 %v192_v39, %v204_v46  ;;  %v294_v56 = vmul.f32 %v287_v47, %v594_v40  ;;  %v377_v57 = vrot.slane %v350_v48, %v561_v6  ;;  %v177_v58 = vrot.slane %v163_v26, %v559_v5 }
  0x36   :  { %v372_v59 = vmul.f32 %v365_v52, %v603_v49  ;;  %v117_v60 = vsub.f32 %v103_v44, %v115_v53  ;;  %v189_v61 = vrot.slane %v152_v54, %v561_v6  ;;  %v242_v4 = vrot.slane %v228_v62, %v559_v5 }
  0x37   :  { %v208_v63 = vadd.f32 %v206_v55, %v116_v45  ;;  %v296_v0 = vsub.f32 %v282_v50, %v294_v56  ;;  %v384_v1 = vmul.f32 %v377_v57, %v606_v51  ;;  %v201_v2 = vrot.slane %v177_v58, %v561_v6 }
  0x38   :  { %v193_v3 = vmul.f32 %v189_v61, %v574_v23  ;;  %v253_v7 = vcombine.high %v426_v31, %v426_v31  ;;  %v318_v8 = vcombine.high %v427_v37, %v427_v37  ;;  %v343_v13 = vcombine.high %v428_v43, %v428_v43 }
  0x39   :  { %v298_v9 = vadd.f32 %v296_v0, %v208_v63  ;;  %v386_v10 = vsub.f32 %v372_v59, %v384_v1  ;;  %v205_v11 = vmul.f32 %v201_v2, %v578_v28  ;;  %v279_v17 = vrot.slane %v242_v4, %v561_v6 }
  0x3a   :  { %v267_v14 = vrot.slane %v253_v7, %v559_v5  ;;  %v332_v18 = vrot.slane %v318_v8, %v559_v5  ;;  %v120_v19 = vmul.f32 %v95_v16, %v567_v15  ;;  %v357_v24 = vrot.slane %v343_v13, %v559_v5 }
  0x3b   :  { %v388_v20 = vadd.f32 %v386_v10, %v298_v9  ;;  %v207_v22 = vsub.f32 %v193_v3, %v205_v11  ;;  %v122_v25 = vmul.f32 %v107_v21, %v565_v12  ;;  %v283_v26 = vmul.f32 %v279_v17, %v588_v36 }
  0x3c   :  { %v291_v27 = vrot.slane %v267_v14, %v561_v6  ;;  %v369_v30 = vrot.slane %v332_v18, %v561_v6  ;;  %v210_v31 = vmul.f32 %v185_v29, %v578_v28  ;;  %v381_v35 = vrot.slane %v357_v24, %v561_v6 }
  0x3d   :  { %398 = vst [vmem:[#allocation7] sm:$0xff] %v388_v20  ;;  %v209_v33 = vadd.f32 %v207_v22, %v117_v60  ;;  %v124_v37 = vadd.f32 %v122_v25, %v120_v19  ;;  %v212_v16 = vmul.f32 %v197_v34, %v574_v23  ;;  %v300_v21 = vmul.f32 %v275_v41, %v594_v40 }
  0x3e   :  { %v295_v39 = vmul.f32 %v291_v27, %v594_v40  ;;  %v373_v5 = vmul.f32 %v369_v30, %v603_v49  ;;  %v302_v42 = vmul.f32 %v287_v47, %v588_v36  ;;  %v385_v43 = vmul.f32 %v381_v35, %v606_v51 }
  0x3f   :  { %v214_v44 = vadd.f32 %v212_v16, %v210_v31  ;;  %v390_v29 = vmul.f32 %v365_v52, %v606_v51  ;;  %v392_v45 = vmul.f32 %v377_v57, %v603_v49  ;;  %v121_v34 = vmul.f32 %v583_v32, %v567_v15 }
  0x40   :  { %v297_v46 = vsub.f32 %v283_v26, %v295_v39  ;;  %v304_v6 = vadd.f32 %v302_v42, %v300_v21  ;;  %v123_v48 = vmul.f32 %v591_v38, %v565_v12  ;;  %v387_v50 = vsub.f32 %v373_v5, %v385_v43 }
  0x41   :  { %v216_v53 = vadd.f32 %v214_v44, %v124_v37  ;;  %v394_v41 = vadd.f32 %v392_v45, %v390_v29  ;;  %v211_v47 = vmul.f32 %v189_v61, %v578_v28  ;;  %v213_v56 = vmul.f32 %v201_v2, %v574_v23 }
  0x42   :  { %v299_v54 = vadd.f32 %v297_v46, %v209_v33  ;;  %v125_v55 = vadd.f32 %v123_v48, %v121_v34  ;;  %v301_v52 = vmul.f32 %v279_v17, %v594_v40  ;;  %v303_v58 = vmul.f32 %v291_v27, %v588_v36 }
  0x43   :  { %v306_v57 = vadd.f32 %v304_v6, %v216_v53  ;;  %v391_v59 = vmul.f32 %v369_v30, %v606_v51  ;;  %v393_v15 = vmul.f32 %v381_v35, %v603_v49  ;;  %v215_v12 = vadd.f32 %v213_v56, %v211_v47 }
  0x44   :  { %v389_v32 = vadd.f32 %v387_v50, %v299_v54  ;;  %v305_v60 = vadd.f32 %v303_v58, %v301_v52 }
  0x45   :  { %v396_v38 = vadd.f32 %v394_v41, %v306_v57  ;;  %v217_v62 = vadd.f32 %v215_v12, %v125_v55  ;;  %v395_v28 = vadd.f32 %v393_v15, %v391_v59 }
  0x46   :  { %399 = vst [vmem:[#allocation7 + $0x8] sm:$0xff] %v389_v32 }
  0x47   :  { %401 = vst [vmem:[#allocation7 + $0x10] sm:$0xff] %v396_v38  ;;  %v307_v23 = vadd.f32 %v305_v60, %v217_v62 }
  0x49   :  { %v397_v61 = vadd.f32 %v395_v28, %v307_v23 }
  0x4b   :  { %402 = vst [vmem:[#allocation7 + $0x18] sm:$0xff] %v397_v61 }
  0x4c   :  { %492 = shalt.err (!%p489_p6)
}
  0x4d   :  { %s493_s12 = scalar_lea.hbm %s668_s2, 512 }
  0x4e   :  { %p494_p7 = scmp.ne.s32.totalorder %s668_s2, %s493_s12  ;;  %p497_p8 = scmp.lt.u32.totalorder %s493_s12, %s668_s2 }
  0x50   :  { %p499_p9 = pnand %p497_p8, %p494_p7 }
  0x52   :  { %502 = shalt.err (!%p499_p9)
}
  0x53   :  { %414 = dma.vmem_to_hbm [thread:$0]  %s409_s8, 512, %s668_s2, [#allocation4], %s513_s0, %s513_s0, %s514_s5  }
  0x54   :  { %507 = dma.done.wait [#allocation4], 512  }
  0x55   :  { %508 = vsyncadd [#allocation4], 4294966784 }
  0x56   :  { %418 = vsyncpa [#allocation3], 1 }
  0x57   :  { %419 = vsyncpa [#allocation6], 1 }
  0x58   :  { %420 = vsyncpa [#allocation4], 1 }

</bundles_post_ra>
